<compile_context>
chip_gen: v7x
topology: tpu7x:2x2x1
jax: 0.10.0
libtpu: 0.0.40
codegen_flags: <defaults>
</compile_context>

<pallas_src>
import jax
import jax.numpy as jnp
from jax.experimental import pallas as pl
from jax.experimental.pallas import tpu as pltpu

NUM_FEATURES = 3
NHID = 128
NUM_CLASSES = 2


def _round_up(v, m):
    return (v + m - 1) // m * m


def _make_kernel(num_classes, num_graphs):
    def kernel(bounds_ref, xw_ref, b1_ref, a_ref, w2_ref, b2_ref, out_ref,
               pooled_scr):
        k = pl.program_id(0)
        tile_n = a_ref.shape[0]

        @pl.when(k == 0)
        def _init():
            pooled_scr[...] = jnp.zeros_like(pooled_scr)

        # GCN aggregation for this row tile: h = A_norm[tile, :] @ (X W1) + b1
        h = jnp.dot(a_ref[...], xw_ref[...],
                    preferred_element_type=jnp.float32)           # (tile_n, H)
        h = jnp.maximum(h + b1_ref[...], 0.0)                     # ReLU, f32 -> h >= 0

        # Global max pool over contiguous per-graph node ranges (batch sorted).
        # 0 is a valid masked identity / accumulator init ONLY because h >= 0.
        row = jax.lax.broadcasted_iota(jnp.int32, h.shape, 0) + k * tile_n
        for g in range(num_graphs):                                # real G, unrolled
            start = bounds_ref[g]
            end = bounds_ref[g + 1]
            in_g = jnp.logical_and(row >= start, row < end)
            gmax = jnp.max(jnp.where(in_g, h, 0.0), axis=0, keepdims=True)  # (1, H)
            pooled_scr[g:g + 1, :] = jnp.maximum(pooled_scr[g:g + 1, :], gmax)

        @pl.when(k == pl.num_programs(0) - 1)
        def _finalize():
            logits = jnp.dot(pooled_scr[...].astype(jnp.bfloat16), w2_ref[...],
                             preferred_element_type=jnp.float32) + b2_ref[...]
            if num_classes == 2:
                # pairwise log-softmax via lane slices (avoids cross-lane
                # reductions over a mostly-padded 128-lane vreg).
                l0 = logits[:, 0:1]
                l1 = logits[:, 1:2]
                m = jnp.maximum(l0, l1)
                lse = m + jnp.log(1.0 + jnp.exp(-jnp.abs(l0 - l1)))
            else:
                lane = jax.lax.broadcasted_iota(jnp.int32, logits.shape, 1)
                valid = lane < num_classes
                lm = jnp.where(valid, logits, -3.0e38)
                m = jnp.max(lm, axis=-1, keepdims=True)
                lse = m + jnp.log(jnp.sum(jnp.where(valid, jnp.exp(lm - m), 0.0),
                                          axis=-1, keepdims=True))
            out_ref[...] = logits - lse          # lane-dense (G_pad, C_pad) store

    return kernel


def gnn_forward(x, a_norm, batch, num_graphs, w1, b1, w2, b2):
    """batch must be sorted (PyG convention: nodes of graph g are contiguous)."""
    N, _ = x.shape
    G = int(num_graphs)
    H = w1.shape[1]
    C = w2.shape[1]

    # Row padding / tiling: always a multiple of 128, biggest tile that's sane.
    n_pad = _round_up(N, 128)
    if n_pad <= 512:
        tile_n = n_pad                      # single grid step for small N
    elif n_pad % 512 == 0:
        tile_n = 512
    elif n_pad % 256 == 0:
        tile_n = 256
    else:
        tile_n = 128
    num_tiles = n_pad // tile_n

    g_pad = _round_up(max(G, 8), 8)
    c_pad = _round_up(max(C, 128), 128)

    # X @ W1 precomputed in plain XLA (f32), cast to bf16 for the MXU stream.
    xw = (x.astype(jnp.float32) @ w1.astype(jnp.float32)).astype(jnp.bfloat16)
    xwp = jnp.zeros((n_pad, H), jnp.bfloat16).at[:N, :].set(xw)

    ap = jnp.zeros((n_pad, n_pad), jnp.bfloat16).at[:N, :N].set(
        a_norm.astype(jnp.bfloat16))
    b1f = b1.astype(jnp.float32).reshape(1, H)
    w2p = jnp.zeros((H, c_pad), jnp.bfloat16).at[:, :C].set(w2.astype(jnp.bfloat16))
    b2p = jnp.zeros((1, c_pad), jnp.float32).at[:, :C].set(
        b2.astype(jnp.float32).reshape(1, C))

    # Per-graph contiguous row ranges: bounds[g] = first node of graph g,
    # bounds[G] = N.  Prefetched into SMEM (replaces the one-hot mask input).
    bounds = jnp.searchsorted(batch, jnp.arange(G + 1, dtype=batch.dtype)
                              ).astype(jnp.int32)

    # Explicit VMEM budget (double-buffered inputs + scratch), with headroom.
    est = (2 * n_pad * H * 2            # resident XW1
           + 2 * tile_n * n_pad * 2     # A row tile
           + 2 * H * c_pad * 2          # w2
           + 4 * 8 * 128 * 4            # b1 / b2 padded tiles
           + 2 * g_pad * c_pad * 4      # output slab
           + g_pad * H * 4)             # pooled scratch
    vmem_limit = min(max(int(est * 1.5) + (1 << 20), 4 << 20), 64 << 20)

    out_pad = pl.pallas_call(
        _make_kernel(C, G),
        out_shape=jax.ShapeDtypeStruct((g_pad, c_pad), jnp.float32),
        grid_spec=pltpu.PrefetchScalarGridSpec(
            num_scalar_prefetch=1,
            grid=(num_tiles,),
            in_specs=[
                pl.BlockSpec((n_pad, H), lambda k, b: (0, 0)),       # XW1 (resident)
                pl.BlockSpec((1, H), lambda k, b: (0, 0)),           # b1
                pl.BlockSpec((tile_n, n_pad), lambda k, b: (k, 0)),  # A_norm row tile
                pl.BlockSpec((H, c_pad), lambda k, b: (0, 0)),       # w2 (lane-padded)
                pl.BlockSpec((1, c_pad), lambda k, b: (0, 0)),       # b2 (lane-padded)
            ],
            out_specs=pl.BlockSpec((g_pad, c_pad), lambda k, b: (0, 0)),
            scratch_shapes=[
                pltpu.VMEM((g_pad, H), jnp.float32),   # pooled max accumulator
            ]),
        compiler_params=pltpu.CompilerParams(
            # row axis reduces into the pooled accumulator -> "arbitrary"
            dimension_semantics=("arbitrary",),
            vmem_limit_bytes=vmem_limit),
    )(bounds, xwp, b1f, ap, w2p, b2p)

    return out_pad[:G, :C]


def build_graph(num_graphs=2, nodes_per_graph=8):
    """Two ring graphs; returns edge_index (2, E) and sorted batch (N,)."""
    edges = []
    for g in range(num_graphs):
        base = g * nodes_per_graph
        for i in range(nodes_per_graph):
            s = base + i
            t = base + (i + 1) % nodes_per_graph
            edges.append((s, t))
            edges.append((t, s))
    edge_index = jnp.asarray(edges, dtype=jnp.int32).T
    batch = jnp.repeat(jnp.arange(num_graphs, dtype=jnp.int32), nodes_per_graph)
    return edge_index, batch


def gcn_normalized_adjacency(edge_index, num_nodes):
    """Dense D^{-1/2} (A + I) D^{-1/2} as in PyG GCNConv (add_self_loops=True)."""
    src, dst = edge_index[0], edge_index[1]
    a = jnp.zeros((num_nodes, num_nodes), jnp.float32).at[dst, src].set(1.0)
    a_hat = a + jnp.eye(num_nodes, dtype=jnp.float32)
    deg = jnp.sum(a_hat, axis=1)
    dinv = 1.0 / jnp.sqrt(deg)
    return dinv[:, None] * a_hat * dinv[None, :]


if __name__ == "__main__":
    key = jax.random.PRNGKey(0)
    k_x, k_w1, k_b1, k_w2, k_b2 = jax.random.split(key, 5)

    num_graphs, nodes_per_graph = 2, 8
    N = num_graphs * nodes_per_graph

    # Graph data
    x = jax.random.normal(k_x, (N, NUM_FEATURES), dtype=jnp.float32)
    edge_index, batch = build_graph(num_graphs, nodes_per_graph)
    a_norm = gcn_normalized_adjacency(edge_index, N)

    # Deterministic parameters (Model.__init__: GCNConv(3,128), Linear(128,2))
    w1 = jax.random.normal(k_w1, (NUM_FEATURES, NHID), dtype=jnp.float32) * 0.1
    b1 = jax.random.normal(k_b1, (1, NHID), dtype=jnp.float32) * 0.01
    w2 = jax.random.normal(k_w2, (NHID, NUM_CLASSES), dtype=jnp.float32) * 0.1
    b2 = jax.random.normal(k_b2, (1, NUM_CLASSES), dtype=jnp.float32) * 0.01

    out = gnn_forward(x, a_norm, batch, num_graphs, w1, b1, w2, b2)
    out = jax.block_until_ready(out)

    # Pure-JAX f32 reference
    h_ref = jnp.maximum(a_norm @ (x @ w1) + b1, 0.0)
    mask = batch[None, :] == jnp.arange(num_graphs)[:, None]
    pooled_ref = jnp.stack(
        [jnp.max(jnp.where(mask[g][:, None], h_ref, -jnp.inf), axis=0)
         for g in range(num_graphs)]
    )
    ref = jax.nn.log_softmax(pooled_ref @ w2 + b2, axis=-1)

    assert out.shape == (num_graphs, NUM_CLASSES)
    assert jnp.allclose(out, ref, atol=2e-2, rtol=2e-2), (out, ref)
    print("KERNEL_OK")
</pallas_src>

<mosaic_0001>
module attributes {stable_mosaic.version = 11 : i64} {
  func.func @kernel(%arg0: i32, %arg1: memref<3xi32, #tpu.memory_space<smem>>, %arg2: memref<128x128xbf16, #tpu.memory_space<vmem>>, %arg3: memref<1x128xf32, #tpu.memory_space<vmem>>, %arg4: memref<128x128xbf16, #tpu.memory_space<vmem>>, %arg5: memref<128x128xbf16, #tpu.memory_space<vmem>>, %arg6: memref<1x128xf32, #tpu.memory_space<vmem>>, %arg7: memref<8x128xf32, #tpu.memory_space<vmem>>, %arg8: memref<8x128xf32, #tpu.memory_space<vmem>>) attributes {dimension_semantics = [#tpu.dimension_semantics<arbitrary>], iteration_bounds = array<i64: 1>, scalar_prefetch = 1 : i64, scratch_operands = 1 : i64, tpu.core_type = #tpu.core_type<tc>, window_params = [{pipeline_mode = #tpu.pipeline_mode<synchronous>, transform_indices = @transform_0, window_bounds = array<i64: 128, 128>}, {pipeline_mode = #tpu.pipeline_mode<synchronous>, transform_indices = @transform_1, window_bounds = array<i64: 1, 128>}, {transform_indices = @transform_2, window_bounds = array<i64: 128, 128>}, {pipeline_mode = #tpu.pipeline_mode<synchronous>, transform_indices = @transform_3, window_bounds = array<i64: 128, 128>}, {pipeline_mode = #tpu.pipeline_mode<synchronous>, transform_indices = @transform_4, window_bounds = array<i64: 1, 128>}, {pipeline_mode = #tpu.pipeline_mode<synchronous>, transform_indices = @transform_5, window_bounds = array<i64: 8, 128>}]} {
    %c0_i32 = arith.constant 0 : i32
    %0 = arith.cmpi eq, %arg0, %c0_i32 : i32
    %1 = arith.extui %0 : i1 to i32
    %c0_i32_0 = arith.constant 0 : i32
    %2 = arith.cmpi ne, %1, %c0_i32_0 : i32
    scf.if %2 {
      %cst_23 = arith.constant 0.000000e+00 : f32
      %46 = vector.broadcast %cst_23 : f32 to vector<8x128xf32>
      %c0_24 = arith.constant 0 : index
      %c0_25 = arith.constant 0 : index
      %47 = vector.load %arg8[%c0_24, %c0_25] : memref<8x128xf32, #tpu.memory_space<vmem>>, vector<8x128xf32>
      tpu.vector_store %arg8[%c0_24, %c0_25], %46 {strides = array<i32>} : memref<8x128xf32, #tpu.memory_space<vmem>>, vector<8x128xf32>,
    } else {
    }
    %c0 = arith.constant 0 : index
    %c0_1 = arith.constant 0 : index
    %3 = vector.load %arg4[%c0, %c0_1] : memref<128x128xbf16, #tpu.memory_space<vmem>>, vector<128x128xbf16>
    %c0_2 = arith.constant 0 : index
    %c0_3 = arith.constant 0 : index
    %4 = vector.load %arg2[%c0_2, %c0_3] : memref<128x128xbf16, #tpu.memory_space<vmem>>, vector<128x128xbf16>
    %cst = arith.constant dense<0.000000e+00> : vector<128x128xf32>
    %5 = tpu.matmul %3, %4, %cst {dimension_numbers = #tpu.dot_dimension_numbers<[1], [0], [0], [1], [0, 0, 1, 1], [], []>} : vector<128x128xbf16>, vector<128x128xbf16>, vector<128x128xf32> -> vector<128x128xf32>
    %c0_4 = arith.constant 0 : index
    %c0_5 = arith.constant 0 : index
    %6 = vector.load %arg3[%c0_4, %c0_5] : memref<1x128xf32, #tpu.memory_space<vmem>>, vector<1x128xf32>
    %7 = vector.broadcast %6 : vector<1x128xf32> to vector<128x128xf32>
    %8 = arith.addf %5, %7 : vector<128x128xf32>
    %cst_6 = arith.constant 0.000000e+00 : f32
    %9 = vector.broadcast %cst_6 : f32 to vector<128x128xf32>
    %10 = arith.maximumf %8, %9 : vector<128x128xf32>
    %11 = tpu.iota {dimensions = array<i32: 0>} : vector<128x128xi32>
    %c128_i32 = arith.constant 128 : i32
    %12 = arith.muli %arg0, %c128_i32 : i32
    %13 = vector.broadcast %12 : i32 to vector<128x128xi32>
    %14 = arith.addi %11, %13 : vector<128x128xi32>
    %c0_7 = arith.constant 0 : index
    %15 = memref.load %arg1[%c0_7] : memref<3xi32, #tpu.memory_space<smem>>
    %c1 = arith.constant 1 : index
    %16 = memref.load %arg1[%c1] : memref<3xi32, #tpu.memory_space<smem>>
    %17 = vector.broadcast %15 : i32 to vector<128x128xi32>
    %18 = arith.cmpi sge, %14, %17 : vector<128x128xi32>
    %19 = vector.broadcast %16 : i32 to vector<128x128xi32>
    %20 = arith.cmpi slt, %14, %19 : vector<128x128xi32>
    %21 = arith.andi %18, %20 : vector<128x128xi1>
    %cst_8 = arith.constant 0.000000e+00 : f32
    %22 = vector.broadcast %cst_8 : f32 to vector<128x128xf32>
    %23 = arith.select %21, %10, %22 : vector<128x128xi1>, vector<128x128xf32>
    %cst_9 = arith.constant dense<0xFF800000> : vector<128xf32>
    %24 = vector.multi_reduction <maximumf>, %23, %cst_9 [0] : vector<128x128xf32> to vector<128xf32>
    %25 = vector.shape_cast %24 : vector<128xf32> to vector<1x128xf32>
    %c0_10 = arith.constant 0 : index
    %c0_11 = arith.constant 0 : index
    %26 = vector.load %arg8[%c0_10, %c0_11] : memref<8x128xf32, #tpu.memory_space<vmem>>, vector<1x128xf32>
    %27 = arith.maximumf %26, %25 : vector<1x128xf32>
    %c0_12 = arith.constant 0 : index
    %c0_13 = arith.constant 0 : index
    %28 = vector.load %arg8[%c0_12, %c0_13] : memref<8x128xf32, #tpu.memory_space<vmem>>, vector<1x128xf32>
    tpu.vector_store %arg8[%c0_12, %c0_13], %27 {strides = array<i32>} : memref<8x128xf32, #tpu.memory_space<vmem>>, vector<1x128xf32>,
    %c1_14 = arith.constant 1 : index
    %29 = memref.load %arg1[%c1_14] : memref<3xi32, #tpu.memory_space<smem>>
    %c2 = arith.constant 2 : index
    %30 = memref.load %arg1[%c2] : memref<3xi32, #tpu.memory_space<smem>>
    %31 = vector.broadcast %29 : i32 to vector<128x128xi32>
    %32 = arith.cmpi sge, %14, %31 : vector<128x128xi32>
    %33 = vector.broadcast %30 : i32 to vector<128x128xi32>
    %34 = arith.cmpi slt, %14, %33 : vector<128x128xi32>
    %35 = arith.andi %32, %34 : vector<128x128xi1>
    %cst_15 = arith.constant 0.000000e+00 : f32
    %36 = vector.broadcast %cst_15 : f32 to vector<128x128xf32>
    %37 = arith.select %35, %10, %36 : vector<128x128xi1>, vector<128x128xf32>
    %cst_16 = arith.constant dense<0xFF800000> : vector<128xf32>
    %38 = vector.multi_reduction <maximumf>, %37, %cst_16 [0] : vector<128x128xf32> to vector<128xf32>
    %39 = vector.shape_cast %38 : vector<128xf32> to vector<1x128xf32>
    %c1_17 = arith.constant 1 : index
    %c0_18 = arith.constant 0 : index
    %40 = vector.load %arg8[%c1_17, %c0_18] : memref<8x128xf32, #tpu.memory_space<vmem>>, vector<1x128xf32>
    %41 = arith.maximumf %40, %39 : vector<1x128xf32>
    %c1_19 = arith.constant 1 : index
    %c0_20 = arith.constant 0 : index
    %42 = vector.load %arg8[%c1_19, %c0_20] : memref<8x128xf32, #tpu.memory_space<vmem>>, vector<1x128xf32>
    tpu.vector_store %arg8[%c1_19, %c0_20], %41 {strides = array<i32>} : memref<8x128xf32, #tpu.memory_space<vmem>>, vector<1x128xf32>,
    %c0_i32_21 = arith.constant 0 : i32
    %43 = arith.cmpi eq, %arg0, %c0_i32_21 : i32
    %44 = arith.extui %43 : i1 to i32
    %c0_i32_22 = arith.constant 0 : i32
    %45 = arith.cmpi ne, %44, %c0_i32_22 : i32
    scf.if %45 {
      %c0_23 = arith.constant 0 : index
      %c0_24 = arith.constant 0 : index
      %46 = vector.load %arg8[%c0_23, %c0_24] : memref<8x128xf32, #tpu.memory_space<vmem>>, vector<8x128xf32>
      %47 = arith.truncf %46 : vector<8x128xf32> to vector<8x128xbf16>
      %c0_25 = arith.constant 0 : index
      %c0_26 = arith.constant 0 : index
      %48 = vector.load %arg5[%c0_25, %c0_26] : memref<128x128xbf16, #tpu.memory_space<vmem>>, vector<128x128xbf16>
      %cst_27 = arith.constant dense<0.000000e+00> : vector<8x128xf32>
      %49 = tpu.matmul %47, %48, %cst_27 {dimension_numbers = #tpu.dot_dimension_numbers<[1], [0], [0], [1], [0, 0, 1, 1], [], []>} : vector<8x128xbf16>, vector<128x128xbf16>, vector<8x128xf32> -> vector<8x128xf32>
      %c0_28 = arith.constant 0 : index
      %c0_29 = arith.constant 0 : index
      %50 = vector.load %arg6[%c0_28, %c0_29] : memref<1x128xf32, #tpu.memory_space<vmem>>, vector<1x128xf32>
      %51 = vector.broadcast %50 : vector<1x128xf32> to vector<8x128xf32>
      %52 = arith.addf %49, %51 : vector<8x128xf32>
      %53 = vector.extract_strided_slice %52 {offsets = [0, 0], sizes = [8, 1], strides = [1, 1]} : vector<8x128xf32> to vector<8x1xf32>
      %54 = vector.extract_strided_slice %52 {offsets = [0, 1], sizes = [8, 1], strides = [1, 1]} : vector<8x128xf32> to vector<8x1xf32>
      %55 = arith.maximumf %53, %54 : vector<8x1xf32>
      %56 = arith.subf %53, %54 : vector<8x1xf32>
      %57 = math.absf %56 : vector<8x1xf32>
      %cst_30 = arith.constant 0.000000e+00 : f32
      %58 = vector.broadcast %cst_30 : f32 to vector<8x1xf32>
      %59 = arith.subf %58, %57 : vector<8x1xf32>
      %60 = math.exp %59 : vector<8x1xf32>
      %cst_31 = arith.constant 1.000000e+00 : f32
      %61 = vector.broadcast %cst_31 : f32 to vector<8x1xf32>
      %62 = arith.addf %61, %60 : vector<8x1xf32>
      %63 = math.log %62 : vector<8x1xf32>
      %64 = arith.addf %55, %63 : vector<8x1xf32>
      %65 = vector.broadcast %64 : vector<8x1xf32> to vector<8x128xf32>
      %66 = arith.subf %52, %65 : vector<8x128xf32>
      %c0_32 = arith.constant 0 : index
      %c0_33 = arith.constant 0 : index
      %67 = vector.load %arg7[%c0_32, %c0_33] : memref<8x128xf32, #tpu.memory_space<vmem>>, vector<8x128xf32>
      tpu.vector_store %arg7[%c0_32, %c0_33], %66 {strides = array<i32>} : memref<8x128xf32, #tpu.memory_space<vmem>>, vector<8x128xf32>,
    } else {
    }
    return
  }
  func.func @transform_0(%arg0: i32, %arg1: memref<3xi32, #tpu.memory_space<smem>>) -> (i32, i32) {
    %c0_i32 = arith.constant 0 : i32
    %c0_i32_0 = arith.constant 0 : i32
    %c0_i32_1 = arith.constant 0 : i32
    return %c0_i32, %c0_i32_0 : i32, i32
  }
  func.func @transform_1(%arg0: i32, %arg1: memref<3xi32, #tpu.memory_space<smem>>) -> (i32, i32) {
    %c0_i32 = arith.constant 0 : i32
    %c0_i32_0 = arith.constant 0 : i32
    %c0_i32_1 = arith.constant 0 : i32
    return %c0_i32, %c0_i32_0 : i32, i32
  }
  func.func @transform_2(%arg0: i32, %arg1: memref<3xi32, #tpu.memory_space<smem>>) -> (i32, i32) {
    %c0_i32 = arith.constant 0 : i32
    %c0_i32_0 = arith.constant 0 : i32
    return %arg0, %c0_i32 : i32, i32
  }
  func.func @transform_3(%arg0: i32, %arg1: memref<3xi32, #tpu.memory_space<smem>>) -> (i32, i32) {
    %c0_i32 = arith.constant 0 : i32
    %c0_i32_0 = arith.constant 0 : i32
    %c0_i32_1 = arith.constant 0 : i32
    return %c0_i32, %c0_i32_0 : i32, i32
  }
  func.func @transform_4(%arg0: i32, %arg1: memref<3xi32, #tpu.memory_space<smem>>) -> (i32, i32) {
    %c0_i32 = arith.constant 0 : i32
    %c0_i32_0 = arith.constant 0 : i32
    %c0_i32_1 = arith.constant 0 : i32
    return %c0_i32, %c0_i32_0 : i32, i32
  }
  func.func @transform_5(%arg0: i32, %arg1: memref<3xi32, #tpu.memory_space<smem>>) -> (i32, i32) {
    %c0_i32 = arith.constant 0 : i32
    %c0_i32_0 = arith.constant 0 : i32
    %c0_i32_1 = arith.constant 0 : i32
    return %c0_i32, %c0_i32_0 : i32, i32
  }
}

</mosaic_0001>

<bundles_post_ra>
// kernel: tpu_custom_call.1
= control target key start
LH: loop header
LB: loop body
LE: loop exit
PB: predicated region body
PF: predicated region fallthrough
CT: control target
= control target key end

     0   :  { %s1605_s0 = inlined_call_operand.hbm [shape: s32[3], index: 0, kind: input, shape index: {}]   ;;  %s1606_s1 = inlined_call_operand.hbm [shape: bf16[128,128], index: 1, kind: input, shape index: {}]   ;;  %s1607_s2 = inlined_call_operand.vmem [shape: f32[1,128], index: 2, kind: input, shape index: {}]   ;;  %s1608_s3 = inlined_call_operand.hbm [shape: bf16[128,128], index: 3, kind: input, shape index: {}]   ;;  %s1609_s4 = inlined_call_operand.hbm [shape: bf16[128,128], index: 4, kind: input, shape index: {}]   ;;  %s1610_s5 = inlined_call_operand.vmem [shape: f32[1,128], index: 5, kind: input, shape index: {}]   ;;  %s1611_s6 = inlined_call_operand.hbm [shape: f32[8,128], index: 6, kind: output, shape index: {}]  }
   0x1   :  { %s839_s23 = scalar_lea.hbm %s1605_s0, 16 }
   0x2   :  { %p840_p0 = scmp.ne.s32.totalorder %s1605_s0, %s839_s23  ;;  %p843_p1 = scmp.lt.u32.totalorder %s839_s23, %s1605_s0 }
   0x4   :  { %p845_p2 = pnand %p843_p1, %p840_p0 }
   0x6   :  { %848 = shalt.err (!%p845_p2)  }
   0x7   :  { %s945_s28 = smov [#allocation4]  }
   0x8   :  { %12 = dma.hbm_to_smem %s1605_s0, 16, %s945_s28, [#allocation3] }
   0x9   :  { %937 = dma.done.wait [#allocation3], 16 }
   0xa   :  { %938 = vsyncadd [#allocation3], 4294967280 }
   0xb   :  { %14 = sfence }
   0xc   :  { %15 = vsyncpa [#allocation6], 0 }
   0xd   :  { %16 = vsyncpa [#allocation9], 0 }
   0xe   :  { %17 = vsyncpa [#allocation7], 0  ;;  %s946_s7 = smov [#allocation8]   ;;  %s947_s9 = smov [#allocation5]  }
   0xf   :  { %s37_s8 = sshll.u32 %s946_s7, 4  ;;  %s23_s10 = sshll.u32 %s947_s9, 4  ;;  %s38_s8 = int_to_ptr.vmem [resolvable:$true] %s37_s8  ;;  %s1003_s10 = int_to_ptr.vmem [resolvable:$true] %s23_s10 }
  0x10   :  { %s849_s13 = scalar_lea.hbm %s1608_s3, 1024 }
  0x11   :  { %p850_p3 = scmp.ne.s32.totalorder %s1608_s3, %s849_s13  ;;  %p853_p4 = scmp.lt.u32.totalorder %s849_s13, %s1608_s3 }
  0x13   :  { %p855_p5 = pnand %p853_p4, %p850_p3 }
  0x15   :  { %858 = shalt.err (!%p855_p5)
}
  0x16   :  { %s859_s17 = scalar_lea.vmem %s38_s8, 1024  ;;  %p864_p7 = scmp.lt.s32.totalorder %s38_s8, %s38_s8 }
  0x17   :  { %p860_p6 = scmp.ne.s32.totalorder %s38_s8, %s859_s17  ;;  %p865_p8 = scmp.lt.s32.totalorder %s859_s17, %s859_s17 }
  0x19   :  { %p866_p9 = por %p865_p8, %p864_p7 }
  0x1b   :  { %p867_p10 = pnand %p866_p9, %p860_p6 }
  0x1d   :  { %870 = shalt.err (!%p867_p10)
}
  0x1e   :  { %s948_s18 = smov 64   ;;  %s949_s19 = smov 4  }
  0x1f   :  { %43 = dma.hbm_to_vmem [thread:$0]  %s1608_s3, 1024, %s38_s8, [#allocation9], %s948_s18, %s948_s18, %s949_s19  }
  0x20   :  { %s871_s24 = scalar_lea.hbm %s1606_s1, 1024 }
  0x21   :  { %p872_p11 = scmp.ne.s32.totalorder %s1606_s1, %s871_s24  ;;  %p875_p12 = scmp.lt.u32.totalorder %s871_s24, %s1606_s1 }
  0x23   :  { %p877_p13 = pnand %p875_p12, %p872_p11 }
  0x25   :  { %880 = shalt.err (!%p877_p13)
}
  0x26   :  { %s881_s29 = scalar_lea.vmem %s1003_s10, 1024  ;;  %p886_p1 = scmp.lt.s32.totalorder %s1003_s10, %s1003_s10 }
  0x27   :  { %p882_p0 = scmp.ne.s32.totalorder %s1003_s10, %s881_s29  ;;  %p887_p2 = scmp.lt.s32.totalorder %s881_s29, %s881_s29 }
  0x29   :  { %p888_p3 = por %p887_p2, %p886_p1 }
  0x2b   :  { %p889_p4 = pnand %p888_p3, %p882_p0 }
  0x2d   :  { %892 = shalt.err (!%p889_p4)
}
  0x2e   :  { %29 = dma.hbm_to_vmem [thread:$0]  %s1606_s1, 1024, %s1003_s10, [#allocation6], %s948_s18, %s948_s18, %s949_s19  }
  0x2f   :  { %s950_s7 = smov [#allocation10]   ;;  %s893_s12 = scalar_lea.hbm %s1609_s4, 1024 }
  0x30   :  { %s49_s8 = sshll.u32 %s950_s7, 4  ;;  %p894_p5 = scmp.ne.s32.totalorder %s1609_s4, %s893_s12  ;;  %s50_s8 = int_to_ptr.vmem [resolvable:$true] %s49_s8 }
  0x31   :  { %p897_p6 = scmp.lt.u32.totalorder %s893_s12, %s1609_s4 }
  0x33   :  { %p899_p7 = pnand %p897_p6, %p894_p5 }
  0x35   :  { %902 = shalt.err (!%p899_p7)
}
  0x36   :  { %s903_s16 = scalar_lea.vmem %s50_s8, 1024  ;;  %p908_p9 = scmp.lt.s32.totalorder %s50_s8, %s50_s8 }
  0x37   :  { %p904_p8 = scmp.ne.s32.totalorder %s50_s8, %s903_s16  ;;  %p909_p10 = scmp.lt.s32.totalorder %s903_s16, %s903_s16 }
  0x39   :  { %p910_p11 = por %p909_p10, %p908_p9 }
  0x3b   :  { %p911_p12 = pnand %p910_p11, %p904_p8 }
  0x3d   :  { %914 = shalt.err (!%p911_p12)
}
  0x3e   :  { %55 = dma.hbm_to_vmem [thread:$0]  %s1609_s4, 1024, %s50_s8, [#allocation9], %s948_s18, %s948_s18, %s949_s19  }
  0x3f   :  { %939 = dma.done.wait [#allocation6], 1024  }
  0x40   :  { %940 = vsyncadd [#allocation6], 4294966272 }
  0x41   :  { %941 = dma.done.wait [#allocation9], 2048  }
  0x42   :  { %942 = vsyncadd [#allocation9], 4294965248  ;;  %v811_v0 = vld [vmem:[#allocation5] sm:$0xff]   ;;  %v812_v1 = vld [vmem:[#allocation5 + $0x8] sm:$0xff]   ;;  %v951_v17 = vmov 0.0   ;;  %vm952_vm0 = vmmov 0   ;;  %v321_v25 = vlaneseq }
  0x43   :  { %747 = vmatprep.subr.bf16.mxu0 %v811_v0  ;;  %v813_v2 = vld [vmem:[#allocation5 + $0x10] sm:$0xff]   ;;  %v814_v3 = vld [vmem:[#allocation5 + $0x18] sm:$0xff]   ;;  %v819_v4 = vld [vmem:[#allocation8] sm:$0xff]   ;;  %72 = vst [vmem:[#allocation2] sm:$0xff] %v951_v17  ;;  %779 = vmatprep.subr.bf16.mxu1 %v951_v17  ;;  %s356_s4 = sld [smem:[#allocation4]]  ;;  %s710_s17 = sld [smem:[#allocation4 + $0x1]] }
  0x44   :  { %748 = vmatpush3.bf16.msra.mxu0 %v811_v0  ;;  %763 = vmatprep.mubr.bf16.mxu0 %v819_v4  ;;  %v815_v5 = vld [vmem:[#allocation5 + $0x20] sm:$0xff]   ;;  %v816_v6 = vld [vmem:[#allocation5 + $0x28] sm:$0xff]   ;;  %v817_v7 = vld [vmem:[#allocation5 + $0x30] sm:$0xff]   ;;  %s712_s18 = sld [smem:[#allocation4 + $0x2]]  ;;  %v1055_v26 = vshrl.u32 %v321_v25, 7  ;;  %s953_s22 = smov 127  }
  0x45   :  { %749 = vmatprep.subr.bf16.mxu0 %v812_v1  ;;  %v818_v8 = vld [vmem:[#allocation5 + $0x38] sm:$0xff]   ;;  %v820_v9 = vld [vmem:[#allocation8 + $0x8] sm:$0xff]   ;;  %v821_v10 = vld [vmem:[#allocation8 + $0x10] sm:$0xff]   ;;  %795 = vmatprep.mubr.msk.bf16.mxu1 %vm952_vm0, %v951_v17 }
  0x46   :  { %v822_v11 = vld [vmem:[#allocation8 + $0x18] sm:$0xff]   ;;  %v823_v12 = vld [vmem:[#allocation8 + $0x20] sm:$0xff]   ;;  %v824_v13 = vld [vmem:[#allocation8 + $0x28] sm:$0xff]   ;;  %v324_v27 = vadd.s32 16, %v1055_v26  ;;  %v325_v31 = vadd.s32 24, %v1055_v26  ;;  %v323_v32 = vadd.s32 8, %v1055_v26 }
  0x47   :  { %v825_v14 = vld [vmem:[#allocation8 + $0x30] sm:$0xff]   ;;  %v826_v15 = vld [vmem:[#allocation8 + $0x38] sm:$0xff]   ;;  %v827_v16 = vld [vmem:[#allocation10] sm:$0xff]   ;;  %v1071_v33 = vadd.s32 48, %v1055_v26  ;;  %v1080_v34 = vadd.s32 32, %v1055_v26  ;;  %v1091_v35 = vadd.s32 56, %v1055_v26 }
  0x48   :  { %750 = vmatpush3.bf16.msra.mxu0 %v812_v1  ;;  %780 = vmatpush3.bf16.msra.mxu1 %v827_v16  ;;  %v828_v18 = vld [vmem:[#allocation10 + $0x8] sm:$0xff]   ;;  %v829_v19 = vld [vmem:[#allocation10 + $0x10] sm:$0xff]   ;;  %v830_v20 = vld [vmem:[#allocation10 + $0x18] sm:$0xff]   ;;  %v1103_v37 = vadd.s32 40, %v1055_v26  ;;  %v1136_v42 = vadd.s32 80, %v1055_v26  ;;  %v1154_v46 = vadd.s32 64, %v1055_v26 }
  0x49   :  { %751 = vmatprep.subr.bf16.mxu0 %v813_v2  ;;  %781 = vmatprep.subr.bf16.mxu1 %v951_v17  ;;  %v831_v21 = vld [vmem:[#allocation10 + $0x20] sm:$0xff]   ;;  %v832_v22 = vld [vmem:[#allocation10 + $0x28] sm:$0xff]   ;;  %v833_v23 = vld [vmem:[#allocation10 + $0x30] sm:$0xff]   ;;  %v1058_v28 = vstv %s356_s4  ;;  %v1060_v29 = vstv %s710_s17  ;;  %v1187_v52 = vadd.s32 88, %v1055_v26  ;;  %v1218_v56 = vadd.s32 72, %v1055_v26 }
  0x4a   :  { %v834_v24 = vld [vmem:[#allocation10 + $0x38] sm:$0xff]   ;;  %v1062_v30 = vstv %s712_s18  ;;  %vm361_vm1 = vcmp.ge.s32.totalorder %v324_v27, %v1058_v28  ;;  %vm378_vm2 = vcmp.lt.s32.totalorder %v324_v27, %v1060_v29  ;;  %vm453_vm3 = vcmp.ge.s32.totalorder %v324_v27, %v1060_v29 }
  0x4b   :  { %vm470_vm4 = vcmp.lt.s32.totalorder %v324_v27, %v1062_v30  ;;  %vm359_vm5 = vcmp.ge.s32.totalorder %v1055_v26, %v1058_v28  ;;  %vm376_vm6 = vcmp.lt.s32.totalorder %v1055_v26, %v1060_v29  ;;  %vm451_vm7 = vcmp.ge.s32.totalorder %v1055_v26, %v1060_v29  ;;  %v1096_v36 = vld [vmem:[%s1607_s2] ss:$0 sm:$0xff]  ;;  %vm1109_vm13 = vmand %vm361_vm1, %vm378_vm2 }
  0x4c   :  { %752 = vmatpush3.bf16.msra.mxu0 %v813_v2  ;;  %782 = vmatpush3.bf16.msra.mxu1 %v828_v18  ;;  %vm468_vm8 = vcmp.lt.s32.totalorder %v1055_v26, %v1062_v30  ;;  %vm362_vm9 = vcmp.ge.s32.totalorder %v325_v31, %v1058_v28  ;;  %vm379_vm10 = vcmp.lt.s32.totalorder %v325_v31, %v1060_v29  ;;  %vm1125_vm1 = vmand %vm453_vm3, %vm470_vm4  ;;  %v1260_v0 = vadd.s32 112, %v1055_v26 }
  0x4d   :  { %753 = vmatprep.subr.bf16.mxu0 %v814_v3  ;;  %783 = vmatprep.subr.bf16.mxu1 %v951_v17  ;;  %vm471_vm12 = vcmp.lt.s32.totalorder %v325_v31, %v1062_v30  ;;  %vm382_vm15 = vcmp.lt.s32.totalorder %v1071_v33, %v1060_v29  ;;  %vm380_vm2 = vcmp.lt.s32.totalorder %v1080_v34, %v1060_v29  ;;  %vm1145_vm3 = vmand %vm359_vm5, %vm376_vm6  ;;  %v337_v51 = vadd.s32 120, %v1055_v26 }
  0x4e   :  { %vm1163_vm5 = vmand %vm451_vm7, %vm468_vm8  ;;  %vm1622_vm0 = vcmp.ge.s32.totalorder %v325_v31, %v1060_v29  ;;  %vm1625_vm11 = vcmp.lt.s32.totalorder %v323_v32, %v1060_v29  ;;  %vm1629_vm8 = vcmp.lt.s32.totalorder %v323_v32, %v1062_v30  ;;  %vm1630_vm6 = vcmp.ge.s32.totalorder %v323_v32, %v1060_v29 }
  0x4f   :  { %vm1178_vm7 = vmand %vm362_vm9, %vm379_vm10  ;;  %vm479_vm9 = vcmp.lt.s32.totalorder %v1187_v52, %v1062_v30 }
  0x50   :  { %754 = vmatpush3.bf16.msra.mxu0 %v814_v3  ;;  %784 = vmatpush3.bf16.msra.mxu1 %v829_v19  ;;  %vm1193_vm4 = vmand %vm1622_vm0, %vm471_vm12  ;;  %vm1626_vm12 = vcmp.ge.s32.totalorder %v323_v32, %v1058_v28 }
  0x51   :  { %755 = vmatprep.subr.bf16.mxu0 %v815_v5  ;;  %785 = vmatprep.subr.bf16.mxu1 %v951_v17  ;;  %vm1209_vm0 = vmand %vm1626_vm12, %vm1625_vm11  ;;  %vm1633_vm11 = vcmp.ge.s32.totalorder %v1071_v33, %v1058_v28 }
  0x52   :  { %vm1224_vm14 = vmand %vm1630_vm6, %vm1629_vm8  ;;  %vm1637_vm8 = vcmp.ge.s32.totalorder %v1071_v33, %v1060_v29  ;;  %vm1640_vm6 = vcmp.ge.s32.totalorder %v1080_v34, %v1058_v28 }
  0x53   :  { %vm1234_vm12 = vmand %vm1633_vm11, %vm382_vm15  ;;  %vm1636_vm15 = vcmp.lt.s32.totalorder %v1071_v33, %v1062_v30 }
  0x54   :  { %756 = vmatpush3.bf16.msra.mxu0 %v815_v5  ;;  %786 = vmatpush3.bf16.msra.mxu1 %v830_v20  ;;  %vm1253_vm11 = vmand %vm1637_vm8, %vm1636_vm15  ;;  %vm387_vm15 = vcmp.lt.s32.totalorder %v1187_v52, %v1060_v29 }
  0x55   :  { %757 = vmatprep.subr.bf16.mxu0 %v816_v6  ;;  %787 = vmatprep.subr.bf16.mxu1 %v951_v17  ;;  %vm1269_vm10 = vmand %vm1640_vm6, %vm380_vm2  ;;  %vm1643_vm2 = vcmp.lt.s32.totalorder %v1080_v34, %v1062_v30  ;;  %vm1644_vm6 = vcmp.ge.s32.totalorder %v1080_v34, %v1060_v29 }
  0x56   :  { %vm1294_vm8 = vmand %vm1644_vm6, %vm1643_vm2  ;;  %vm1647_vm2 = vcmp.lt.s32.totalorder %v1091_v35, %v1060_v29  ;;  %vm1648_vm6 = vcmp.ge.s32.totalorder %v1091_v35, %v1058_v28 }
  0x58   :  { %758 = vmatpush3.bf16.msra.mxu0 %v816_v6  ;;  %788 = vmatpush3.bf16.msra.mxu1 %v831_v21 }
  0x59   :  { %759 = vmatprep.subr.bf16.mxu0 %v817_v7  ;;  %789 = vmatprep.subr.bf16.mxu1 %v951_v17 }
  0x5c   :  { %760 = vmatpush3.bf16.msra.mxu0 %v817_v7  ;;  %790 = vmatpush3.bf16.msra.mxu1 %v832_v22 }
  0x5d   :  { %761 = vmatprep.subr.bf16.mxu0 %v818_v8  ;;  %791 = vmatprep.subr.bf16.mxu1 %v951_v17 }
  0x60   :  { %762 = vmatpush3.bf16.msra.mxu0 %v818_v8  ;;  %792 = vmatpush3.bf16.msra.mxu1 %v833_v23 }
  0x61   :  { %793 = vmatprep.subr.bf16.mxu1 %v951_v17 }
  0x63   :  { %764 = vmatmul.mubr.bf16.vlgmr.msra.gmra.mrb[0].mxu0 %v820_v9  ;;  %v1303_v9 = vadd.s32 96, %v1055_v26 }
  0x64   :  { %767 = vmatprep.mubr.bf16.mxu0 %v821_v10  ;;  %794 = vmatpush3.bf16.msra.mxu1 %v834_v24 }
  0x6b   :  { %768 = vmatmul.mubr.bf16.gmra.mrb[4].mxu0 %v822_v11 }
  0x6c   :  { %771 = vmatprep.mubr.bf16.mxu0 %v823_v12 }
  0x73   :  { %772 = vmatmul.mubr.bf16.gmra.mrb[8].mxu0 %v824_v13 }
  0x74   :  { %775 = vmatprep.mubr.bf16.mxu0 %v825_v14 }
  0x7b   :  { %776 = vmatmul.mubr.bf16.gmra.mrb[12].mxu0 %v826_v15 }
 0x136   :  { %v765_v38 = vpop.f32.mrb[0].mxu0 }
 0x137   :  { %v242_v41 = vpop.f32.mrb[1].mxu0  ;;  %v251_v43 = vadd.f32 %v765_v38, %v1096_v36 }
 0x138   :  { %v766_v45 = vpop.f32.mrb[2].mxu0  ;;  %v243_v47 = vadd.f32 %v1096_v36, %v242_v41 }
 0x139   :  { %v245_v49 = vpop.f32.mrb[3].mxu0  ;;  %v254_v50 = vadd.f32 %v766_v45, %v1096_v36  ;;  %v307_v54 = vmax.f32 %v251_v43, 0.0 }
 0x13a   :  { %v305_v57 = vmax.f32 %v243_v47, 0.0  ;;  %v1245_v61 = vadd.f32 %v1096_v36, %v245_v49 }
 0x13b   :  { %v308_v60 = vmax.f32 %v254_v50, 0.0  ;;  %v1281_v4 = vsel %vm1109_vm13, %v307_v54, 0.0  ;;  %v1285_v5 = vsel %vm1125_vm1, %v307_v54, 0.0  ;;  %vm1320_vm13 = vmand %vm1648_vm6, %vm1647_vm2  ;;  %vm1651_vm2 = vcmp.lt.s32.totalorder %v1091_v35, %v1062_v30 }
 0x13c   :  { %v1307_v10 = vsel %vm1145_vm3, %v305_v57, 0.0  ;;  %v1311_v11 = vsel %vm1163_vm5, %v305_v57, 0.0  ;;  %vm477_vm5 = vcmp.lt.s32.totalorder %v1218_v56, %v1062_v30  ;;  %v306_v17 = vmax.f32 %v1245_v61, 0.0 }
 0x13d   :  { %v1330_v16 = vsel %vm1178_vm7, %v308_v60, 0.0  ;;  %vm1652_vm6 = vcmp.ge.s32.totalorder %v1091_v35, %v1060_v29  ;;  %vm390_vm7 = vcmp.lt.s32.totalorder %v1260_v0, %v1060_v29  ;;  %v1350_v21 = vsel %vm1193_vm4, %v308_v60, 0.0 }
 0x13e   :  { %v769_v62 = vpop.f32.mrb[4].mxu0  ;;  %vm1339_vm1 = vmand %vm1652_vm6, %vm1651_vm2  ;;  %vm1655_vm2 = vcmp.lt.s32.totalorder %v1103_v37, %v1060_v29  ;;  %vm1656_vm6 = vcmp.ge.s32.totalorder %v1103_v37, %v1058_v28  ;;  %v409_v48 = vsel %vm1209_vm0, %v306_v17, 0.0  ;;  %vm1672_vm4 = vcmp.ge.s32.totalorder %v1154_v46, %v1058_v28 }
 0x13f   :  { %v267_v1 = vadd.f32 %v769_v62, %v1096_v36  ;;  %v258_v2 = vpop.f32.mrb[5].mxu0  ;;  %vm1362_vm3 = vmand %vm1656_vm6, %vm1655_vm2  ;;  %vm1660_vm2 = vcmp.ge.s32.totalorder %v1103_v37, %v1060_v29  ;;  %v501_v53 = vsel %vm1224_vm14, %v306_v17, 0.0  ;;  %vm1675_vm0 = vcmp.lt.s32.totalorder %v1154_v46, %v1062_v30 }
 0x140   :  { %v259_v6 = vadd.f32 %v1096_v36, %v258_v2  ;;  %v770_v8 = vpop.f32.mrb[6].mxu0  ;;  %vm1679_vm14 = vcmp.ge.s32.totalorder %v1187_v52, %v1058_v28 }
 0x141   :  { %v311_v12 = vmax.f32 %v267_v1, 0.0  ;;  %v270_v13 = vadd.f32 %v770_v8, %v1096_v36  ;;  %v261_v15 = vpop.f32.mrb[7].mxu0 }
 0x142   :  { %v309_v18 = vmax.f32 %v259_v6, 0.0  ;;  %v262_v20 = vadd.f32 %v1096_v36, %v261_v15 }
 0x143   :  { %v414_v22 = vsel %vm1234_vm12, %v311_v12, 0.0  ;;  %v506_v23 = vsel %vm1253_vm11, %v311_v12, 0.0  ;;  %v312_v24 = vmax.f32 %v270_v13, 0.0  ;;  %vm1659_vm11 = vcmp.lt.s32.totalorder %v1103_v37, %v1062_v30 }
 0x144   :  { %v426_v27 = vmax.f32 %v1281_v4, %v414_v22  ;;  %v518_v31 = vmax.f32 %v1285_v5, %v506_v23  ;;  %v412_v32 = vsel %vm1269_vm10, %v309_v18, 0.0  ;;  %v504_v33 = vsel %vm1294_vm8, %v309_v18, 0.0  ;;  %vm1382_vm6 = vmand %vm1660_vm2, %vm1659_vm11 }
 0x145   :  { %v424_v35 = vmax.f32 %v1307_v10, %v412_v32  ;;  %v516_v38 = vmax.f32 %v1311_v11, %v504_v33  ;;  %v415_v39 = vsel %vm1320_vm13, %v312_v24, 0.0  ;;  %v507_v40 = vsel %vm1339_vm1, %v312_v24, 0.0 }
 0x146   :  { %vm1663_vm10 = vcmp.lt.s32.totalorder %v1136_v42, %v1060_v29  ;;  %vm1664_vm8 = vcmp.ge.s32.totalorder %v1136_v42, %v1058_v28  ;;  %v427_v41 = vmax.f32 %v1330_v16, %v415_v39  ;;  %v519_v43 = vmax.f32 %v1350_v21, %v507_v40  ;;  %v773_v45 = vpop.f32.mrb[8].mxu0 }
 0x147   :  { %vm1400_vm11 = vmand %vm1664_vm8, %vm1663_vm10  ;;  %v310_v44 = vmax.f32 %v262_v20, 0.0  ;;  %vm1667_vm13 = vcmp.lt.s32.totalorder %v1136_v42, %v1062_v30  ;;  %vm1668_vm1 = vcmp.ge.s32.totalorder %v1136_v42, %v1060_v29  ;;  %vm388_vm10 = vcmp.lt.s32.totalorder %v1303_v9, %v1060_v29  ;;  %v274_v50 = vpop.f32.mrb[9].mxu0 }
 0x148   :  { %vm1412_vm2 = vmand %vm1668_vm1, %vm1667_vm13  ;;  %v283_v49 = vadd.f32 %v773_v45, %v1096_v36  ;;  %vm1671_vm8 = vcmp.lt.s32.totalorder %v1154_v46, %v1060_v29  ;;  %vm463_vm13 = vcmp.ge.s32.totalorder %v1303_v9, %v1060_v29  ;;  %v275_v57 = vadd.f32 %v1096_v36, %v274_v50  ;;  %v774_v58 = vpop.f32.mrb[10].mxu0 }
 0x149   :  { %vm1427_vm12 = vmand %vm1672_vm4, %vm1671_vm8  ;;  %v413_v54 = vsel %vm1362_vm3, %v310_v44, 0.0  ;;  %v505_v55 = vsel %vm1382_vm6, %v310_v44, 0.0  ;;  %vm1676_vm4 = vcmp.ge.s32.totalorder %v1154_v46, %v1060_v29  ;;  %v286_v63 = vadd.f32 %v774_v58, %v1096_v36  ;;  %v277_v46 = vpop.f32.mrb[11].mxu0 }
 0x14a   :  { %vm1447_vm1 = vmand %vm1676_vm4, %vm1675_vm0  ;;  %v425_v60 = vmax.f32 %v409_v48, %v413_v54  ;;  %v517_v61 = vmax.f32 %v501_v53, %v505_v55  ;;  %v315_v62 = vmax.f32 %v283_v49, 0.0  ;;  %v313_v2 = vmax.f32 %v275_v57, 0.0 }
 0x14b   :  { %vm1458_vm3 = vmand %vm1679_vm14, %vm387_vm15  ;;  %vm1682_vm6 = vcmp.ge.s32.totalorder %v1187_v52, %v1060_v29  ;;  %v278_v4 = vadd.f32 %v1096_v36, %v277_v46  ;;  %vm480_vm15 = vcmp.lt.s32.totalorder %v1303_v9, %v1062_v30  ;;  %v335_v5 = vadd.s32 104, %v1055_v26 }
 0x14c   :  { %vm1468_vm8 = vmand %vm1682_vm6, %vm479_vm9  ;;  %v418_v6 = vsel %vm1400_vm11, %v315_v62, 0.0  ;;  %v510_v7 = vsel %vm1412_vm2, %v315_v62, 0.0  ;;  %v316_v8 = vmax.f32 %v286_v63, 0.0  ;;  %vm1685_vm9 = vcmp.lt.s32.totalorder %v1218_v56, %v1060_v29 }
 0x14d   :  { %vm1686_vm0 = vcmp.ge.s32.totalorder %v1218_v56, %v1058_v28  ;;  %vm374_vm14 = vcmp.ge.s32.totalorder %v337_v51, %v1058_v28  ;;  %v430_v26 = vmax.f32 %v426_v27, %v418_v6  ;;  %v522_v10 = vmax.f32 %v518_v31, %v510_v7 }
 0x14e   :  { %vm1486_vm4 = vmand %vm1686_vm0, %vm1685_vm9  ;;  %v416_v11 = vsel %vm1427_vm12, %v313_v2, 0.0  ;;  %v508_v12 = vsel %vm1447_vm1, %v313_v2, 0.0  ;;  %vm1689_vm11 = vcmp.ge.s32.totalorder %v1218_v56, %v1060_v29  ;;  %v419_v16 = vsel %vm1458_vm3, %v316_v8, 0.0  ;;  %v777_v21 = vpop.f32.mrb[12].mxu0  ;;  %v713_v56 = vld [vmem:[%s1610_s5] ss:$0 sm:$0xff] }
 0x14f   :  { %vm1501_vm2 = vmand %vm1689_vm11, %vm477_vm5  ;;  %v428_v14 = vmax.f32 %v424_v35, %v416_v11  ;;  %v520_v15 = vmax.f32 %v516_v38, %v508_v12  ;;  %v511_v17 = vsel %vm1468_vm8, %v316_v8, 0.0  ;;  %vm1692_vm12 = vcmp.ge.s32.totalorder %v1260_v0, %v1058_v28  ;;  %v290_v24 = vpop.f32.mrb[13].mxu0  ;;  %v537_v11 = vld [vmem:[#allocation2 + $0x1] sm:$0x1]  ;;  %s955_s5 = smov [#allocation11]  }
 0x150   :  { %vm1515_vm1 = vmand %vm1692_vm12, %vm390_vm7  ;;  %v431_v18 = vmax.f32 %v427_v41, %v419_v16  ;;  %v523_v19 = vmax.f32 %v519_v43, %v511_v17  ;;  %v314_v20 = vmax.f32 %v278_v4, 0.0  ;;  %vm1695_vm5 = vcmp.lt.s32.totalorder %v1260_v0, %v1062_v30  ;;  %v778_v33 = vpop.f32.mrb[14].mxu0  ;;  %s683_s23 = sshll.u32 %s955_s5, 4  ;;  %s684_s23 = int_to_ptr.vmem [resolvable:$true] %s683_s23 }
 0x151   :  { %vm1696_vm3 = vcmp.ge.s32.totalorder %v1260_v0, %v1060_v29  ;;  %vm391_vm8 = vcmp.lt.s32.totalorder %v337_v51, %v1060_v29  ;;  %v299_v23 = vadd.f32 %v777_v21, %v1096_v36  ;;  %vm1699_vm7 = vcmp.ge.s32.totalorder %v1303_v9, %v1058_v28  ;;  %v293_v9 = vpop.f32.mrb[15].mxu0  ;;  %s915_s24 = scalar_lea.vmem %s684_s23, 128  ;;  %p920_p0 = scmp.lt.s32.totalorder %s684_s23, %s684_s23 }
 0x152   :  { %vm1525_vm6 = vmand %vm1696_vm3, %vm1695_vm5  ;;  %vm466_vm0 = vcmp.ge.s32.totalorder %v337_v51, %v1060_v29  ;;  %vm483_vm11 = vcmp.lt.s32.totalorder %v337_v51, %v1062_v30  ;;  %vm372_vm12 = vcmp.ge.s32.totalorder %v335_v5, %v1058_v28  ;;  %v417_v0 = vsel %vm1486_vm4, %v314_v20, 0.0  ;;  %p916_p13 = scmp.ne.s32.totalorder %s684_s23, %s915_s24  ;;  %p921_p1 = scmp.lt.s32.totalorder %s915_s24, %s915_s24 }
 0x153   :  { %vm1537_vm9 = vmand %vm1699_vm7, %vm388_vm10  ;;  %v509_v27 = vsel %vm1501_vm2, %v314_v20, 0.0  ;;  %v291_v31 = vadd.f32 %v1096_v36, %v290_v24  ;;  %vm389_vm5 = vcmp.lt.s32.totalorder %v335_v5, %v1060_v29  ;;  %v429_v34 = vmax.f32 %v425_v60, %v417_v0 }
 0x154   :  { %vm1555_vm10 = vmand %vm463_vm13, %vm480_vm15  ;;  %v521_v35 = vmax.f32 %v517_v61, %v509_v27  ;;  %v319_v38 = vmax.f32 %v299_v23, 0.0  ;;  %v302_v39 = vadd.f32 %v778_v33, %v1096_v36  ;;  %v294_v41 = vadd.f32 %v1096_v36, %v293_v9  ;;  %p922_p2 = por %p921_p1, %p920_p0 }
 0x155   :  { %vm1565_vm4 = vmand %vm374_vm14, %vm391_vm8  ;;  %v317_v37 = vmax.f32 %v291_v31, 0.0  ;;  %vm464_vm15 = vcmp.ge.s32.totalorder %v335_v5, %v1060_v29  ;;  %vm481_vm2 = vcmp.lt.s32.totalorder %v335_v5, %v1062_v30  ;;  %v954_v23 = vmov 0  }
 0x156   :  { %vm499_vm13 = vmand %vm466_vm0, %vm483_vm11  ;;  %v422_v43 = vsel %vm1515_vm1, %v319_v38, 0.0  ;;  %v514_v44 = vsel %vm1525_vm6, %v319_v38, 0.0  ;;  %v320_v45 = vmax.f32 %v302_v39, 0.0  ;;  %v318_v55 = vmax.f32 %v294_v41, 0.0  ;;  %810 = vset.pattern.permute.xlu0 %v954_v23  ;;  %p923_p3 = pnand %p922_p2, %p916_p13 }
 0x157   :  { %v434_v47 = vmax.f32 %v430_v26, %v422_v43  ;;  %v526_v48 = vmax.f32 %v522_v10, %v514_v44  ;;  %v420_v49 = vsel %vm1537_vm9, %v317_v37, 0.0  ;;  %v512_v50 = vsel %vm1555_vm10, %v317_v37, 0.0  ;;  %vm405_vm14 = vmand %vm372_vm12, %vm389_vm5  ;;  %v445_v10 = vld [vmem:[#allocation2] sm:$0x1] }
 0x158   :  { %v432_v30 = vmax.f32 %v428_v14, %v420_v49  ;;  %v524_v36 = vmax.f32 %v520_v15, %v512_v50  ;;  %v423_v42 = vsel %vm1565_vm4, %v320_v45, 0.0  ;;  %v515_v51 = vsel %vm499_vm13, %v320_v45, 0.0  ;;  %vm497_vm1 = vmand %vm464_vm15, %vm481_vm2 }
 0x159   :  { %v435_v53 = vmax.f32 %v431_v18, %v423_v42  ;;  %v527_v54 = vmax.f32 %v523_v19, %v515_v51  ;;  %v421_v58 = vsel %vm405_vm14, %v318_v55, 0.0  ;;  %v513_v60 = vsel %vm497_vm1, %v318_v55, 0.0 }
 0x15a   :  { %v433_v61 = vmax.f32 %v429_v34, %v421_v58  ;;  %v525_v62 = vmax.f32 %v521_v35, %v513_v60 }
 0x15b   :  { %v437_v57 = vmax.f32 %v434_v47, %v435_v53  ;;  %v529_v59 = vmax.f32 %v526_v48, %v527_v54 }
 0x15c   :  { %v436_v29 = vmax.f32 %v432_v30, %v433_v61  ;;  %v528_v63 = vmax.f32 %v524_v36, %v525_v62 }
 0x15e   :  { %v438_v28 = vmax.f32 %v436_v29, %v437_v57  ;;  %v530_v1 = vmax.f32 %v528_v63, %v529_v59 }
 0x160   :  { %v439_v46 = vrot.slane %v438_v28, 4  ;;  %v531_v2 = vrot.slane %v530_v1, 4 }
 0x162   :  { %v440_v3 = vmax.f32 %v438_v28, %v439_v46  ;;  %v532_v4 = vmax.f32 %v530_v1, %v531_v2 }
 0x164   :  { %v441_v5 = vrot.slane %v440_v3, 2  ;;  %v533_v6 = vrot.slane %v532_v4, 2 }
 0x166   :  { %v442_v7 = vmax.f32 %v440_v3, %v441_v5  ;;  %v534_v8 = vmax.f32 %v532_v4, %v533_v6 }
 0x168   :  { %v443_v52 = vrot.slane %v442_v7, 1  ;;  %v535_v26 = vrot.slane %v534_v8, 1 }
 0x16a   :  { %v444_v12 = vmax.f32 %v442_v7, %v443_v52  ;;  %v536_v13 = vmax.f32 %v534_v8, %v535_v26 }
 0x16c   :  { %v446_v14 = vmax.f32 %v445_v10, %v444_v12  ;;  %v538_v15 = vmax.f32 %v537_v11, %v536_v13 }
 0x16e   :  { %447 = vst [vmem:[#allocation2] sm:$0x1] %v446_v14  ;;  %539 = vst [vmem:[#allocation2 + $0x1] sm:$0x1] %v538_v15 }
 0x175   :  { %v543_v16 = vld [vmem:[#allocation2] sm:$0xff] }
 0x176   :  { %v544_v17 = vpack.c.bf16 %v543_v16, %v543_v16 }
 0x178   :  { %796 = vmatmul.mubr.bf16.vlgmr.msra.gmra.mrb[0].mxu1 %v544_v17 }
 0x24b   :  { %v650_v18 = vpop.f32.mrb[0].mxu1 }
 0x24c   :  { %v651_v19 = vadd.f32 %v713_v56, %v650_v18  ;;  %v797_v20 = vpop.f32.mrb[1].mxu1 }
 0x24d   :  { %v653_v21 = vpop.f32.mrb[2].mxu1 }
 0x24e   :  { %657 = vrot.lane.b32.xlu0 %v651_v19, %s953_s22  ;;  %v798_v22 = vpop.f32.mrb[3].mxu1 }
 0x2c0   :  { %v658_v24 = vpop.permute.xlu0 %657 }
 0x2c1   :  { %v661_v25 = vsub.f32 %v651_v19, %v658_v24  ;;  %v660_v35 = vmax.f32 %v651_v19, %v658_v24 }
 0x2c3   :  { %v662_v0 = vand.u32 2147483647, %v661_v25 }
 0x2c5   :  { %v663_v27 = vsub.f32 0.0, %v662_v0 }
 0x2c7   :  { %v664_v31 = vmul.f32 1.442695, %v663_v27 }
 0x2c9   :  { %835 = vpow2.f32 %v664_v31 }
 0x2d3   :  { %v836_v32 = vpop.eup %835 }
 0x2d4   :  { %v666_v33 = vadd.f32 1.0, %v836_v32 }
 0x2d6   :  { %837 = vlog2.f32 %v666_v33 }
 0x2e0   :  { %v838_v34 = vpop.eup %837 }
 0x2e1   :  { %v668_v38 = vmul.f32 0.6931472, %v838_v34 }
 0x2e3   :  { %v669_v39 = vadd.f32 %v668_v38, %v660_v35 }
 0x2e5   :  { %672 = vperm.xlu0 %810, %v669_v39  }
 0x364   :  { %v673_v40 = vpop.permute.xlu0 %672 }
 0x365   :  { %v675_v9 = vsub.f32 %v651_v19, %v673_v40 }
 0x367   :  { %676 = vst [vmem:[#allocation11] sm:$0xff] %v675_v9 }
 0x368   :  { %926 = shalt.err (!%p923_p3)
}
 0x369   :  { %s927_s27 = scalar_lea.hbm %s1611_s6, 128 }
 0x36a   :  { %p928_p4 = scmp.ne.s32.totalorder %s1611_s6, %s927_s27  ;;  %p931_p5 = scmp.lt.u32.totalorder %s927_s27, %s1611_s6 }
 0x36c   :  { %p933_p6 = pnand %p931_p5, %p928_p4 }
 0x36e   :  { %936 = shalt.err (!%p933_p6)
}
 0x36f   :  { %686 = dma.vmem_to_hbm [thread:$0]  %s684_s23, 128, %s1611_s6, [#allocation7]  }
 0x370   :  { %943 = dma.done.wait [#allocation7], 128  }
 0x371   :  { %944 = vsyncadd [#allocation7], 4294967168 }
 0x372   :  { %690 = vsyncpa [#allocation6], 1 }
 0x373   :  { %691 = vsyncpa [#allocation9], 1 }
 0x374   :  { %692 = vsyncpa [#allocation7], 1 }

</bundles_post_ra>
